<compile_context>
chip_gen: v7x
topology: tpu7x:2x2x1
jax: 0.10.0
libtpu: 0.0.40
codegen_flags: <defaults>
</compile_context>

<pallas_src>
import functools
import numpy as np
import jax
import jax.numpy as jnp
from jax import lax
from jax.experimental import pallas as pl
from jax.experimental.pallas import tpu as pltpu


# ----------------------------- fused kernel ---------------------------------

def _feat_fused_kernel(temp_ref, proto_ref, query_ref,
                       wq_ref, wk_ref, wv_ref, fcw_ref, aff_ref,
                       out_ref, *, hdim, batch):
    """One invocation handles every episode.

    proto_ref : [B, n_way,   Hp]   (Hp = hdim zero-padded to mult of 128)
    query_ref : [B, n_query, Hp]
    w*_ref    : [Hp, Hp]  (already transposed: x @ W == torch Linear)
    aff_ref   : [3, Hp]   rows = (fc bias, LN gamma, LN beta), zero in pad lanes
    out_ref   : [B, n_query, n_way]
    """
    inv_temp = np.float32(1.0 / np.sqrt(hdim))   # d_k == hdim (square weights)
    inv_h = np.float32(1.0 / hdim)

    # load shared operands once
    wq = wq_ref[...]
    wk = wk_ref[...]
    wv = wv_ref[...]
    fcw = fcw_ref[...]
    fcb = aff_ref[0:1, :]
    gamma = aff_ref[1:2, :]
    beta = aff_ref[2:3, :]
    temp = temp_ref[0, 0]

    for b in range(batch):                      # static unroll, B is tiny
        x = proto_ref[b]                        # [n_way, Hp] f32

        # single-head projections (dropout = identity in eval)
        q = jnp.dot(x, wq, preferred_element_type=jnp.float32)
        k = jnp.dot(x, wk, preferred_element_type=jnp.float32)
        v = jnp.dot(x, wv, preferred_element_type=jnp.float32)

        # scaled dot-product attention; contract last dims (no transpose op)
        s = lax.dot_general(q, k, (((1,), (1,)), ((), ())),
                            preferred_element_type=jnp.float32) * inv_temp
        s = s - jnp.max(s, axis=-1, keepdims=True)
        e = jnp.exp(s)
        attn = e * pl.reciprocal(jnp.sum(e, axis=-1, keepdims=True), approx=True)
        o = jnp.dot(attn, v, preferred_element_type=jnp.float32)

        # fc + residual + LayerNorm (padded lanes stay exactly zero)
        o = jnp.dot(o, fcw, preferred_element_type=jnp.float32) + fcb
        y = o + x
        mean = jnp.sum(y, axis=-1, keepdims=True) * inv_h
        ex2 = jnp.sum(y * y, axis=-1, keepdims=True) * inv_h
        var = ex2 - mean * mean
        p_ad = (y - mean) * lax.rsqrt(var + 1e-5) * gamma + beta

        # cosine logits: temp * norm(query) @ norm(proto)^T
        xq = query_ref[b]                       # [n_query, Hp]
        p_n = p_ad * lax.rsqrt(
            jnp.maximum(jnp.sum(p_ad * p_ad, axis=-1, keepdims=True), 1e-24))
        q_n = xq * lax.rsqrt(
            jnp.maximum(jnp.sum(xq * xq, axis=-1, keepdims=True), 1e-24))
        logits = lax.dot_general(q_n, p_n, (((1,), (1,)), ((), ())),
                                 preferred_element_type=jnp.float32)
        out_ref[b] = temp * logits


# ----------------------------- wrapper ---------------------------------------

def feat_forward(x_shot, x_pseudo, x_query, params):
    """x_shot: [B, n_way, n_shot, C, H, W]; x_pseudo: [B, n_way, n_pseudo, C, H, W];
       x_query: [B, n_query, C, H, W].  Returns logits [B, n_query, n_way]."""
    B, n_way = x_shot.shape[:2]
    n_query = x_query.shape[1]
    hdim = int(np.prod(x_shot.shape[3:]))
    Hp = ((hdim + 127) // 128) * 128            # lane-dense padding
    pad = Hp - hdim

    # protos = cat([x_shot, x_pseudo], dim=2).mean(2).view(B, n_way, -1)
    shots = jnp.concatenate(
        [x_shot.reshape(B, n_way, x_shot.shape[2], hdim),
         x_pseudo.reshape(B, n_way, x_pseudo.shape[2], hdim)], axis=2)
    protos = shots.mean(axis=2)                 # [B, n_way, hdim]
    xq = x_query.reshape(B, n_query, hdim)      # [B, n_query, hdim]

    def pad_last(a):
        return jnp.pad(a, [(0, 0)] * (a.ndim - 1) + [(0, pad)]) if pad else a

    def pad_w_t(w):                             # transpose + zero-pad to (Hp, Hp)
        wt = w.T
        return jnp.pad(wt, ((0, pad), (0, pad))) if pad else wt

    protos_p = pad_last(protos)
    xq_p = pad_last(xq)
    wqT = pad_w_t(params["wq"])
    wkT = pad_w_t(params["wk"])
    wvT = pad_w_t(params["wv"])
    fcwT = pad_w_t(params["fcw"])
    aff = pad_last(jnp.concatenate(
        [params["fcb"].reshape(1, hdim),
         params["gamma"].reshape(1, hdim),
         params["beta"].reshape(1, hdim)], axis=0))          # [3, Hp]
    temp_arr = jnp.reshape(jnp.asarray(params["temp"], jnp.float32), (1, 1))

    kernel = functools.partial(_feat_fused_kernel, hdim=hdim, batch=B)

    return pl.pallas_call(
        kernel,
        out_shape=jax.ShapeDtypeStruct((B, n_query, n_way), jnp.float32),
        grid=(1,),
        in_specs=[
            pl.BlockSpec(memory_space=pltpu.MemorySpace.SMEM),          # temp
            pl.BlockSpec((B, n_way, Hp),   lambda i: (0, 0, 0)),        # protos
            pl.BlockSpec((B, n_query, Hp), lambda i: (0, 0, 0)),        # queries
            pl.BlockSpec((Hp, Hp), lambda i: (0, 0)),                   # wq^T
            pl.BlockSpec((Hp, Hp), lambda i: (0, 0)),                   # wk^T
            pl.BlockSpec((Hp, Hp), lambda i: (0, 0)),                   # wv^T
            pl.BlockSpec((Hp, Hp), lambda i: (0, 0)),                   # fcw^T
            pl.BlockSpec((3, Hp),  lambda i: (0, 0)),                   # fcb/gamma/beta
        ],
        out_specs=pl.BlockSpec((B, n_query, n_way), lambda i: (0, 0, 0)),
        compiler_params=pltpu.CompilerParams(
            dimension_semantics=("arbitrary",)),
    )(temp_arr, protos_p, xq_p, wqT, wkT, wvT, fcwT, aff)


# ----------------------------- reference (pure JAX) --------------------------

def feat_forward_ref(x_shot, x_pseudo, x_query, params):
    B, n_way = x_shot.shape[:2]
    hdim = int(np.prod(x_shot.shape[3:]))
    shots = jnp.concatenate(
        [x_shot.reshape(B, n_way, x_shot.shape[2], hdim),
         x_pseudo.reshape(B, n_way, x_pseudo.shape[2], hdim)], axis=2)
    protos = shots.mean(axis=2)
    xq = x_query.reshape(B, x_query.shape[1], hdim)

    def one(x):
        q = x @ params["wq"].T; k = x @ params["wk"].T; v = x @ params["wv"].T
        a = (q @ k.T) / np.sqrt(hdim)
        a = jax.nn.softmax(a, axis=-1)
        o = a @ v
        o = o @ params["fcw"].T + params["fcb"][0]
        y = o + x
        mean = y.mean(-1, keepdims=True)
        var = ((y - mean) ** 2).mean(-1, keepdims=True)
        y = (y - mean) / jnp.sqrt(var + 1e-5)
        return y * params["gamma"][0] + params["beta"][0]

    p_ad = jax.vmap(one)(protos)
    p_n = p_ad / jnp.maximum(jnp.linalg.norm(p_ad, axis=-1, keepdims=True), 1e-12)
    q_n = xq / jnp.maximum(jnp.linalg.norm(xq, axis=-1, keepdims=True), 1e-12)
    return params["temp"] * jnp.einsum("bqd,bnd->bqn", q_n, p_n)


# ----------------------------- main ------------------------------------------

if __name__ == "__main__":
    # small shapes: B episodes=2, n_way=5, n_shot=1, n_pseudo=2, n_query=6,
    # encoder feature map C=4, H=4, W=4  ->  hdim = 64 (padded to 128 in kernel)
    B, n_way, n_shot, n_pseudo, n_query = 2, 5, 1, 2, 6
    C, H, W = 4, 4, 4
    hdim = C * H * W

    key = jax.random.PRNGKey(0)
    k_xs, k_xp, k_xq, k_wq, k_wk, k_wv, k_fw, k_fb = jax.random.split(key, 8)

    x_shot = jax.random.normal(k_xs, (B, n_way, n_shot, C, H, W), jnp.float32)
    x_pseudo = jax.random.normal(k_xp, (B, n_way, n_pseudo, C, H, W), jnp.float32)
    x_query = jax.random.normal(k_xq, (B, n_query, C, H, W), jnp.float32)

    std_qk = np.sqrt(2.0 / (hdim + hdim))      # normal_(std=sqrt(2/(d_model+d_k)))
    std_v = np.sqrt(2.0 / (hdim + hdim))
    std_fc = np.sqrt(2.0 / (hdim + hdim))      # xavier_normal_
    bound = 1.0 / np.sqrt(hdim)                # default Linear bias init

    params = {
        "wq": std_qk * jax.random.normal(k_wq, (hdim, hdim), jnp.float32),
        "wk": std_qk * jax.random.normal(k_wk, (hdim, hdim), jnp.float32),
        "wv": std_v * jax.random.normal(k_wv, (hdim, hdim), jnp.float32),
        "fcw": std_fc * jax.random.normal(k_fw, (hdim, hdim), jnp.float32),
        "fcb": jax.random.uniform(k_fb, (1, hdim), jnp.float32, -bound, bound),
        "gamma": jnp.ones((1, hdim), jnp.float32),
        "beta": jnp.zeros((1, hdim), jnp.float32),
        "temp": jnp.float32(10.0),             # temp_learnable parameter, init 10.0
    }

    logits = feat_forward(x_shot, x_pseudo, x_query, params)
    logits = jax.block_until_ready(logits)

    ref = feat_forward_ref(x_shot, x_pseudo, x_query, params)
    # tolerance loosened slightly because the softmax denominator uses the
    # EUP approximate reciprocal (pl.reciprocal(approx=True)).
    np.testing.assert_allclose(np.asarray(logits), np.asarray(ref),
                               rtol=2e-3, atol=2e-3)
    assert logits.shape == (B, n_query, n_way)
    print("KERNEL_OK")
</pallas_src>

<mosaic_0001>
module attributes {stable_mosaic.version = 11 : i64} {
  func.func @_feat_fused_kernel(%arg0: i32, %arg1: memref<1x1xf32, #tpu.memory_space<smem>>, %arg2: memref<2x5x128xf32, #tpu.memory_space<vmem>>, %arg3: memref<2x6x128xf32, #tpu.memory_space<vmem>>, %arg4: memref<128x128xf32, #tpu.memory_space<vmem>>, %arg5: memref<128x128xf32, #tpu.memory_space<vmem>>, %arg6: memref<128x128xf32, #tpu.memory_space<vmem>>, %arg7: memref<128x128xf32, #tpu.memory_space<vmem>>, %arg8: memref<3x128xf32, #tpu.memory_space<vmem>>, %arg9: memref<2x6x5xf32, #tpu.memory_space<vmem>>) attributes {dimension_semantics = [#tpu.dimension_semantics<arbitrary>], iteration_bounds = array<i64: 1>, scalar_prefetch = 0 : i64, scratch_operands = 0 : i64, tpu.core_type = #tpu.core_type<tc>, window_params = [{transform_indices = @transform_0, window_bounds = array<i64: 1, 1>}, {pipeline_mode = #tpu.pipeline_mode<synchronous>, transform_indices = @transform_1, window_bounds = array<i64: 2, 5, 128>}, {pipeline_mode = #tpu.pipeline_mode<synchronous>, transform_indices = @transform_2, window_bounds = array<i64: 2, 6, 128>}, {pipeline_mode = #tpu.pipeline_mode<synchronous>, transform_indices = @transform_3, window_bounds = array<i64: 128, 128>}, {pipeline_mode = #tpu.pipeline_mode<synchronous>, transform_indices = @transform_4, window_bounds = array<i64: 128, 128>}, {pipeline_mode = #tpu.pipeline_mode<synchronous>, transform_indices = @transform_5, window_bounds = array<i64: 128, 128>}, {pipeline_mode = #tpu.pipeline_mode<synchronous>, transform_indices = @transform_6, window_bounds = array<i64: 128, 128>}, {pipeline_mode = #tpu.pipeline_mode<synchronous>, transform_indices = @transform_7, window_bounds = array<i64: 3, 128>}, {pipeline_mode = #tpu.pipeline_mode<synchronous>, transform_indices = @transform_8, window_bounds = array<i64: 2, 6, 5>}]} {
    %c0 = arith.constant 0 : index
    %c0_0 = arith.constant 0 : index
    %0 = vector.load %arg4[%c0, %c0_0] : memref<128x128xf32, #tpu.memory_space<vmem>>, vector<128x128xf32>
    %c0_1 = arith.constant 0 : index
    %c0_2 = arith.constant 0 : index
    %1 = vector.load %arg5[%c0_1, %c0_2] : memref<128x128xf32, #tpu.memory_space<vmem>>, vector<128x128xf32>
    %c0_3 = arith.constant 0 : index
    %c0_4 = arith.constant 0 : index
    %2 = vector.load %arg6[%c0_3, %c0_4] : memref<128x128xf32, #tpu.memory_space<vmem>>, vector<128x128xf32>
    %c0_5 = arith.constant 0 : index
    %c0_6 = arith.constant 0 : index
    %3 = vector.load %arg7[%c0_5, %c0_6] : memref<128x128xf32, #tpu.memory_space<vmem>>, vector<128x128xf32>
    %c0_7 = arith.constant 0 : index
    %c0_8 = arith.constant 0 : index
    %4 = vector.load %arg8[%c0_7, %c0_8] : memref<3x128xf32, #tpu.memory_space<vmem>>, vector<1x128xf32>
    %c1 = arith.constant 1 : index
    %c0_9 = arith.constant 0 : index
    %5 = vector.load %arg8[%c1, %c0_9] : memref<3x128xf32, #tpu.memory_space<vmem>>, vector<1x128xf32>
    %c2 = arith.constant 2 : index
    %c0_10 = arith.constant 0 : index
    %6 = vector.load %arg8[%c2, %c0_10] : memref<3x128xf32, #tpu.memory_space<vmem>>, vector<1x128xf32>
    %c0_11 = arith.constant 0 : index
    %c0_12 = arith.constant 0 : index
    %7 = memref.load %arg1[%c0_11, %c0_12] : memref<1x1xf32, #tpu.memory_space<smem>>
    %c0_13 = arith.constant 0 : index
    %c0_14 = arith.constant 0 : index
    %c0_15 = arith.constant 0 : index
    %8 = vector.load %arg2[%c0_13, %c0_14, %c0_15] : memref<2x5x128xf32, #tpu.memory_space<vmem>>, vector<1x5x128xf32>
    %9 = vector.shape_cast %8 : vector<1x5x128xf32> to vector<5x128xf32>
    %cst = arith.constant dense<0.000000e+00> : vector<5x128xf32>
    %10 = tpu.matmul %9, %0, %cst {dimension_numbers = #tpu.dot_dimension_numbers<[1], [0], [0], [1], [0, 0, 1, 1], [], []>} : vector<5x128xf32>, vector<128x128xf32>, vector<5x128xf32> -> vector<5x128xf32>
    %cst_16 = arith.constant dense<0.000000e+00> : vector<5x128xf32>
    %11 = tpu.matmul %9, %1, %cst_16 {dimension_numbers = #tpu.dot_dimension_numbers<[1], [0], [0], [1], [0, 0, 1, 1], [], []>} : vector<5x128xf32>, vector<128x128xf32>, vector<5x128xf32> -> vector<5x128xf32>
    %cst_17 = arith.constant dense<0.000000e+00> : vector<5x128xf32>
    %12 = tpu.matmul %9, %2, %cst_17 {dimension_numbers = #tpu.dot_dimension_numbers<[1], [0], [0], [1], [0, 0, 1, 1], [], []>} : vector<5x128xf32>, vector<128x128xf32>, vector<5x128xf32> -> vector<5x128xf32>
    %cst_18 = arith.constant dense<0.000000e+00> : vector<5x5xf32>
    %13 = tpu.matmul %10, %11, %cst_18 {dimension_numbers = #tpu.dot_dimension_numbers<[1], [1], [0], [0], [0, 0, 1, 0], [], []>} : vector<5x128xf32>, vector<5x128xf32>, vector<5x5xf32> -> vector<5x5xf32>
    %cst_19 = arith.constant 1.250000e-01 : f32
    %14 = vector.broadcast %cst_19 : f32 to vector<5x5xf32>
    %15 = arith.mulf %13, %14 : vector<5x5xf32>
    %cst_20 = arith.constant dense<0xFF800000> : vector<5xf32>
    %16 = vector.multi_reduction <maximumf>, %15, %cst_20 [1] : vector<5x5xf32> to vector<5xf32>
    %17 = vector.shape_cast %16 : vector<5xf32> to vector<5x1xf32>
    %18 = vector.broadcast %17 : vector<5x1xf32> to vector<5x5xf32>
    %19 = arith.subf %15, %18 : vector<5x5xf32>
    %20 = math.exp %19 : vector<5x5xf32>
    %cst_21 = arith.constant dense<0.000000e+00> : vector<5xf32>
    %21 = vector.multi_reduction <add>, %20, %cst_21 [1] : vector<5x5xf32> to vector<5xf32>
    %22 = vector.shape_cast %21 : vector<5xf32> to vector<5x1xf32>
    %23 = tpu.reciprocal %22 {approx = true} : vector<5x1xf32> -> vector<5x1xf32>
    %24 = vector.broadcast %23 : vector<5x1xf32> to vector<5x5xf32>
    %25 = arith.mulf %20, %24 : vector<5x5xf32>
    %cst_22 = arith.constant dense<0.000000e+00> : vector<5x128xf32>
    %26 = tpu.matmul %25, %12, %cst_22 {dimension_numbers = #tpu.dot_dimension_numbers<[1], [0], [0], [1], [0, 0, 1, 1], [], []>} : vector<5x5xf32>, vector<5x128xf32>, vector<5x128xf32> -> vector<5x128xf32>
    %cst_23 = arith.constant dense<0.000000e+00> : vector<5x128xf32>
    %27 = tpu.matmul %26, %3, %cst_23 {dimension_numbers = #tpu.dot_dimension_numbers<[1], [0], [0], [1], [0, 0, 1, 1], [], []>} : vector<5x128xf32>, vector<128x128xf32>, vector<5x128xf32> -> vector<5x128xf32>
    %28 = vector.broadcast %4 : vector<1x128xf32> to vector<5x128xf32>
    %29 = arith.addf %27, %28 : vector<5x128xf32>
    %30 = arith.addf %29, %9 : vector<5x128xf32>
    %cst_24 = arith.constant dense<0.000000e+00> : vector<5xf32>
    %31 = vector.multi_reduction <add>, %30, %cst_24 [1] : vector<5x128xf32> to vector<5xf32>
    %32 = vector.shape_cast %31 : vector<5xf32> to vector<5x1xf32>
    %cst_25 = arith.constant 1.562500e-02 : f32
    %33 = vector.broadcast %cst_25 : f32 to vector<5x1xf32>
    %34 = arith.mulf %32, %33 : vector<5x1xf32>
    %35 = arith.mulf %30, %30 : vector<5x128xf32>
    %cst_26 = arith.constant dense<0.000000e+00> : vector<5xf32>
    %36 = vector.multi_reduction <add>, %35, %cst_26 [1] : vector<5x128xf32> to vector<5xf32>
    %37 = vector.shape_cast %36 : vector<5xf32> to vector<5x1xf32>
    %cst_27 = arith.constant 1.562500e-02 : f32
    %38 = vector.broadcast %cst_27 : f32 to vector<5x1xf32>
    %39 = arith.mulf %37, %38 : vector<5x1xf32>
    %40 = arith.mulf %34, %34 : vector<5x1xf32>
    %41 = arith.subf %39, %40 : vector<5x1xf32>
    %42 = vector.broadcast %34 : vector<5x1xf32> to vector<5x128xf32>
    %43 = arith.subf %30, %42 : vector<5x128xf32>
    %cst_28 = arith.constant 9.99999974E-6 : f32
    %44 = vector.broadcast %cst_28 : f32 to vector<5x1xf32>
    %45 = arith.addf %41, %44 : vector<5x1xf32>
    %46 = math.rsqrt %45 : vector<5x1xf32>
    %47 = vector.broadcast %46 : vector<5x1xf32> to vector<5x128xf32>
    %48 = arith.mulf %43, %47 : vector<5x128xf32>
    %49 = vector.broadcast %5 : vector<1x128xf32> to vector<5x128xf32>
    %50 = arith.mulf %48, %49 : vector<5x128xf32>
    %51 = vector.broadcast %6 : vector<1x128xf32> to vector<5x128xf32>
    %52 = arith.addf %50, %51 : vector<5x128xf32>
    %c0_29 = arith.constant 0 : index
    %c0_30 = arith.constant 0 : index
    %c0_31 = arith.constant 0 : index
    %53 = vector.load %arg3[%c0_29, %c0_30, %c0_31] : memref<2x6x128xf32, #tpu.memory_space<vmem>>, vector<1x6x128xf32>
    %54 = vector.shape_cast %53 : vector<1x6x128xf32> to vector<6x128xf32>
    %55 = arith.mulf %52, %52 : vector<5x128xf32>
    %cst_32 = arith.constant dense<0.000000e+00> : vector<5xf32>
    %56 = vector.multi_reduction <add>, %55, %cst_32 [1] : vector<5x128xf32> to vector<5xf32>
    %57 = vector.shape_cast %56 : vector<5xf32> to vector<5x1xf32>
    %cst_33 = arith.constant 1.000000e-24 : f32
    %58 = vector.broadcast %cst_33 : f32 to vector<5x1xf32>
    %59 = arith.maximumf %57, %58 : vector<5x1xf32>
    %60 = math.rsqrt %59 : vector<5x1xf32>
    %61 = vector.broadcast %60 : vector<5x1xf32> to vector<5x128xf32>
    %62 = arith.mulf %52, %61 : vector<5x128xf32>
    %63 = arith.mulf %54, %54 : vector<6x128xf32>
    %cst_34 = arith.constant dense<0.000000e+00> : vector<6xf32>
    %64 = vector.multi_reduction <add>, %63, %cst_34 [1] : vector<6x128xf32> to vector<6xf32>
    %65 = vector.shape_cast %64 : vector<6xf32> to vector<6x1xf32>
    %cst_35 = arith.constant 1.000000e-24 : f32
    %66 = vector.broadcast %cst_35 : f32 to vector<6x1xf32>
    %67 = arith.maximumf %65, %66 : vector<6x1xf32>
    %68 = math.rsqrt %67 : vector<6x1xf32>
    %69 = vector.broadcast %68 : vector<6x1xf32> to vector<6x128xf32>
    %70 = arith.mulf %54, %69 : vector<6x128xf32>
    %cst_36 = arith.constant dense<0.000000e+00> : vector<6x5xf32>
    %71 = tpu.matmul %70, %62, %cst_36 {dimension_numbers = #tpu.dot_dimension_numbers<[1], [1], [0], [0], [0, 0, 1, 0], [], []>} : vector<6x128xf32>, vector<5x128xf32>, vector<6x5xf32> -> vector<6x5xf32>
    %72 = vector.broadcast %7 : f32 to vector<6x5xf32>
    %73 = arith.mulf %72, %71 : vector<6x5xf32>
    %c0_37 = arith.constant 0 : index
    %c0_38 = arith.constant 0 : index
    %c0_39 = arith.constant 0 : index
    %74 = vector.load %arg9[%c0_37, %c0_38, %c0_39] : memref<2x6x5xf32, #tpu.memory_space<vmem>>, vector<1x6x5xf32>
    %75 = vector.shape_cast %74 : vector<1x6x5xf32> to vector<6x5xf32>
    %76 = vector.shape_cast %73 : vector<6x5xf32> to vector<1x6x5xf32>
    tpu.vector_store %arg9[%c0_37, %c0_38, %c0_39], %76 {strides = array<i32>} : memref<2x6x5xf32, #tpu.memory_space<vmem>>, vector<1x6x5xf32>,
    %c1_40 = arith.constant 1 : index
    %c0_41 = arith.constant 0 : index
    %c0_42 = arith.constant 0 : index
    %77 = vector.load %arg2[%c1_40, %c0_41, %c0_42] : memref<2x5x128xf32, #tpu.memory_space<vmem>>, vector<1x5x128xf32>
    %78 = vector.shape_cast %77 : vector<1x5x128xf32> to vector<5x128xf32>
    %cst_43 = arith.constant dense<0.000000e+00> : vector<5x128xf32>
    %79 = tpu.matmul %78, %0, %cst_43 {dimension_numbers = #tpu.dot_dimension_numbers<[1], [0], [0], [1], [0, 0, 1, 1], [], []>} : vector<5x128xf32>, vector<128x128xf32>, vector<5x128xf32> -> vector<5x128xf32>
    %cst_44 = arith.constant dense<0.000000e+00> : vector<5x128xf32>
    %80 = tpu.matmul %78, %1, %cst_44 {dimension_numbers = #tpu.dot_dimension_numbers<[1], [0], [0], [1], [0, 0, 1, 1], [], []>} : vector<5x128xf32>, vector<128x128xf32>, vector<5x128xf32> -> vector<5x128xf32>
    %cst_45 = arith.constant dense<0.000000e+00> : vector<5x128xf32>
    %81 = tpu.matmul %78, %2, %cst_45 {dimension_numbers = #tpu.dot_dimension_numbers<[1], [0], [0], [1], [0, 0, 1, 1], [], []>} : vector<5x128xf32>, vector<128x128xf32>, vector<5x128xf32> -> vector<5x128xf32>
    %cst_46 = arith.constant dense<0.000000e+00> : vector<5x5xf32>
    %82 = tpu.matmul %79, %80, %cst_46 {dimension_numbers = #tpu.dot_dimension_numbers<[1], [1], [0], [0], [0, 0, 1, 0], [], []>} : vector<5x128xf32>, vector<5x128xf32>, vector<5x5xf32> -> vector<5x5xf32>
    %cst_47 = arith.constant 1.250000e-01 : f32
    %83 = vector.broadcast %cst_47 : f32 to vector<5x5xf32>
    %84 = arith.mulf %82, %83 : vector<5x5xf32>
    %cst_48 = arith.constant dense<0xFF800000> : vector<5xf32>
    %85 = vector.multi_reduction <maximumf>, %84, %cst_48 [1] : vector<5x5xf32> to vector<5xf32>
    %86 = vector.shape_cast %85 : vector<5xf32> to vector<5x1xf32>
    %87 = vector.broadcast %86 : vector<5x1xf32> to vector<5x5xf32>
    %88 = arith.subf %84, %87 : vector<5x5xf32>
    %89 = math.exp %88 : vector<5x5xf32>
    %cst_49 = arith.constant dense<0.000000e+00> : vector<5xf32>
    %90 = vector.multi_reduction <add>, %89, %cst_49 [1] : vector<5x5xf32> to vector<5xf32>
    %91 = vector.shape_cast %90 : vector<5xf32> to vector<5x1xf32>
    %92 = tpu.reciprocal %91 {approx = true} : vector<5x1xf32> -> vector<5x1xf32>
    %93 = vector.broadcast %92 : vector<5x1xf32> to vector<5x5xf32>
    %94 = arith.mulf %89, %93 : vector<5x5xf32>
    %cst_50 = arith.constant dense<0.000000e+00> : vector<5x128xf32>
    %95 = tpu.matmul %94, %81, %cst_50 {dimension_numbers = #tpu.dot_dimension_numbers<[1], [0], [0], [1], [0, 0, 1, 1], [], []>} : vector<5x5xf32>, vector<5x128xf32>, vector<5x128xf32> -> vector<5x128xf32>
    %cst_51 = arith.constant dense<0.000000e+00> : vector<5x128xf32>
    %96 = tpu.matmul %95, %3, %cst_51 {dimension_numbers = #tpu.dot_dimension_numbers<[1], [0], [0], [1], [0, 0, 1, 1], [], []>} : vector<5x128xf32>, vector<128x128xf32>, vector<5x128xf32> -> vector<5x128xf32>
    %97 = vector.broadcast %4 : vector<1x128xf32> to vector<5x128xf32>
    %98 = arith.addf %96, %97 : vector<5x128xf32>
    %99 = arith.addf %98, %78 : vector<5x128xf32>
    %cst_52 = arith.constant dense<0.000000e+00> : vector<5xf32>
    %100 = vector.multi_reduction <add>, %99, %cst_52 [1] : vector<5x128xf32> to vector<5xf32>
    %101 = vector.shape_cast %100 : vector<5xf32> to vector<5x1xf32>
    %cst_53 = arith.constant 1.562500e-02 : f32
    %102 = vector.broadcast %cst_53 : f32 to vector<5x1xf32>
    %103 = arith.mulf %101, %102 : vector<5x1xf32>
    %104 = arith.mulf %99, %99 : vector<5x128xf32>
    %cst_54 = arith.constant dense<0.000000e+00> : vector<5xf32>
    %105 = vector.multi_reduction <add>, %104, %cst_54 [1] : vector<5x128xf32> to vector<5xf32>
    %106 = vector.shape_cast %105 : vector<5xf32> to vector<5x1xf32>
    %cst_55 = arith.constant 1.562500e-02 : f32
    %107 = vector.broadcast %cst_55 : f32 to vector<5x1xf32>
    %108 = arith.mulf %106, %107 : vector<5x1xf32>
    %109 = arith.mulf %103, %103 : vector<5x1xf32>
    %110 = arith.subf %108, %109 : vector<5x1xf32>
    %111 = vector.broadcast %103 : vector<5x1xf32> to vector<5x128xf32>
    %112 = arith.subf %99, %111 : vector<5x128xf32>
    %cst_56 = arith.constant 9.99999974E-6 : f32
    %113 = vector.broadcast %cst_56 : f32 to vector<5x1xf32>
    %114 = arith.addf %110, %113 : vector<5x1xf32>
    %115 = math.rsqrt %114 : vector<5x1xf32>
    %116 = vector.broadcast %115 : vector<5x1xf32> to vector<5x128xf32>
    %117 = arith.mulf %112, %116 : vector<5x128xf32>
    %118 = vector.broadcast %5 : vector<1x128xf32> to vector<5x128xf32>
    %119 = arith.mulf %117, %118 : vector<5x128xf32>
    %120 = vector.broadcast %6 : vector<1x128xf32> to vector<5x128xf32>
    %121 = arith.addf %119, %120 : vector<5x128xf32>
    %c1_57 = arith.constant 1 : index
    %c0_58 = arith.constant 0 : index
    %c0_59 = arith.constant 0 : index
    %122 = vector.load %arg3[%c1_57, %c0_58, %c0_59] : memref<2x6x128xf32, #tpu.memory_space<vmem>>, vector<1x6x128xf32>
    %123 = vector.shape_cast %122 : vector<1x6x128xf32> to vector<6x128xf32>
    %124 = arith.mulf %121, %121 : vector<5x128xf32>
    %cst_60 = arith.constant dense<0.000000e+00> : vector<5xf32>
    %125 = vector.multi_reduction <add>, %124, %cst_60 [1] : vector<5x128xf32> to vector<5xf32>
    %126 = vector.shape_cast %125 : vector<5xf32> to vector<5x1xf32>
    %cst_61 = arith.constant 1.000000e-24 : f32
    %127 = vector.broadcast %cst_61 : f32 to vector<5x1xf32>
    %128 = arith.maximumf %126, %127 : vector<5x1xf32>
    %129 = math.rsqrt %128 : vector<5x1xf32>
    %130 = vector.broadcast %129 : vector<5x1xf32> to vector<5x128xf32>
    %131 = arith.mulf %121, %130 : vector<5x128xf32>
    %132 = arith.mulf %123, %123 : vector<6x128xf32>
    %cst_62 = arith.constant dense<0.000000e+00> : vector<6xf32>
    %133 = vector.multi_reduction <add>, %132, %cst_62 [1] : vector<6x128xf32> to vector<6xf32>
    %134 = vector.shape_cast %133 : vector<6xf32> to vector<6x1xf32>
    %cst_63 = arith.constant 1.000000e-24 : f32
    %135 = vector.broadcast %cst_63 : f32 to vector<6x1xf32>
    %136 = arith.maximumf %134, %135 : vector<6x1xf32>
    %137 = math.rsqrt %136 : vector<6x1xf32>
    %138 = vector.broadcast %137 : vector<6x1xf32> to vector<6x128xf32>
    %139 = arith.mulf %123, %138 : vector<6x128xf32>
    %cst_64 = arith.constant dense<0.000000e+00> : vector<6x5xf32>
    %140 = tpu.matmul %139, %131, %cst_64 {dimension_numbers = #tpu.dot_dimension_numbers<[1], [1], [0], [0], [0, 0, 1, 0], [], []>} : vector<6x128xf32>, vector<5x128xf32>, vector<6x5xf32> -> vector<6x5xf32>
    %141 = vector.broadcast %7 : f32 to vector<6x5xf32>
    %142 = arith.mulf %141, %140 : vector<6x5xf32>
    %c1_65 = arith.constant 1 : index
    %c0_66 = arith.constant 0 : index
    %c0_67 = arith.constant 0 : index
    %143 = vector.load %arg9[%c1_65, %c0_66, %c0_67] : memref<2x6x5xf32, #tpu.memory_space<vmem>>, vector<1x6x5xf32>
    %144 = vector.shape_cast %143 : vector<1x6x5xf32> to vector<6x5xf32>
    %145 = vector.shape_cast %142 : vector<6x5xf32> to vector<1x6x5xf32>
    tpu.vector_store %arg9[%c1_65, %c0_66, %c0_67], %145 {strides = array<i32>} : memref<2x6x5xf32, #tpu.memory_space<vmem>>, vector<1x6x5xf32>,
    return
  }
  func.func @transform_0(%arg0: i32) -> (i32, i32) {
    %c0_i32 = arith.constant 0 : i32
    %c0_i32_0 = arith.constant 0 : i32
    %c0_i32_1 = arith.constant 0 : i32
    return %c0_i32, %c0_i32_0 : i32, i32
  }
  func.func @transform_1(%arg0: i32) -> (i32, i32, i32) {
    %c0_i32 = arith.constant 0 : i32
    %c0_i32_0 = arith.constant 0 : i32
    %c0_i32_1 = arith.constant 0 : i32
    %c0_i32_2 = arith.constant 0 : i32
    return %c0_i32, %c0_i32_0, %c0_i32_1 : i32, i32, i32
  }
  func.func @transform_2(%arg0: i32) -> (i32, i32, i32) {
    %c0_i32 = arith.constant 0 : i32
    %c0_i32_0 = arith.constant 0 : i32
    %c0_i32_1 = arith.constant 0 : i32
    %c0_i32_2 = arith.constant 0 : i32
    return %c0_i32, %c0_i32_0, %c0_i32_1 : i32, i32, i32
  }
  func.func @transform_3(%arg0: i32) -> (i32, i32) {
    %c0_i32 = arith.constant 0 : i32
    %c0_i32_0 = arith.constant 0 : i32
    %c0_i32_1 = arith.constant 0 : i32
    return %c0_i32, %c0_i32_0 : i32, i32
  }
  func.func @transform_4(%arg0: i32) -> (i32, i32) {
    %c0_i32 = arith.constant 0 : i32
    %c0_i32_0 = arith.constant 0 : i32
    %c0_i32_1 = arith.constant 0 : i32
    return %c0_i32, %c0_i32_0 : i32, i32
  }
  func.func @transform_5(%arg0: i32) -> (i32, i32) {
    %c0_i32 = arith.constant 0 : i32
    %c0_i32_0 = arith.constant 0 : i32
    %c0_i32_1 = arith.constant 0 : i32
    return %c0_i32, %c0_i32_0 : i32, i32
  }
  func.func @transform_6(%arg0: i32) -> (i32, i32) {
    %c0_i32 = arith.constant 0 : i32
    %c0_i32_0 = arith.constant 0 : i32
    %c0_i32_1 = arith.constant 0 : i32
    return %c0_i32, %c0_i32_0 : i32, i32
  }
  func.func @transform_7(%arg0: i32) -> (i32, i32) {
    %c0_i32 = arith.constant 0 : i32
    %c0_i32_0 = arith.constant 0 : i32
    %c0_i32_1 = arith.constant 0 : i32
    return %c0_i32, %c0_i32_0 : i32, i32
  }
  func.func @transform_8(%arg0: i32) -> (i32, i32, i32) {
    %c0_i32 = arith.constant 0 : i32
    %c0_i32_0 = arith.constant 0 : i32
    %c0_i32_1 = arith.constant 0 : i32
    %c0_i32_2 = arith.constant 0 : i32
    return %c0_i32, %c0_i32_0, %c0_i32_1 : i32, i32, i32
  }
}

</mosaic_0001>

<bundles_post_ra>
// kernel: tpu_custom_call.1
= control target key start
LH: loop header
LB: loop body
LE: loop exit
PB: predicated region body
PF: predicated region fallthrough
CT: control target
= control target key end

     0   :  { %14 = vsyncpa [#allocation4], 0  ;;  %s2486_s0 = inlined_call_operand.<no memory space> [shape: f32[1,1], index: 0, kind: input, shape index: {}]   ;;  %s2487_s1 = inlined_call_operand.vmem [shape: f32[2,5,128], index: 1, kind: input, shape index: {}]   ;;  %s2488_s2 = inlined_call_operand.vmem [shape: f32[2,6,128], index: 2, kind: input, shape index: {}]   ;;  %s2489_s3 = inlined_call_operand.hbm [shape: f32[128,128], index: 3, kind: input, shape index: {}]   ;;  %s2490_s4 = inlined_call_operand.hbm [shape: f32[128,128], index: 4, kind: input, shape index: {}]   ;;  %s2491_s5 = inlined_call_operand.hbm [shape: f32[128,128], index: 5, kind: input, shape index: {}]   ;;  %s2492_s6 = inlined_call_operand.hbm [shape: f32[128,128], index: 6, kind: input, shape index: {}]   ;;  %s2493_s7 = inlined_call_operand.vmem [shape: f32[3,128], index: 7, kind: input, shape index: {}]   ;;  %s2494_s8 = inlined_call_operand.vmem [shape: f32[2,6,5], index: 8, kind: output, shape index: {}]  }
   0x1   :  { %15 = vsyncpa [#allocation6], 0 }
   0x2   :  { %16 = vsyncpa [#allocation9], 0  ;;  %s2052_s27 = smov [#allocation5]   ;;  %s2053_s29 = smov [#allocation3]  }
   0x3   :  { %s40_s28 = sshll.u32 %s2052_s27, 4  ;;  %s28_s30 = sshll.u32 %s2053_s29, 4  ;;  %s41_s28 = int_to_ptr.vmem [resolvable:$true] %s40_s28  ;;  %s2106_s30 = int_to_ptr.vmem [resolvable:$true] %s28_s30 }
   0x4   :  { %s1958_s11 = scalar_lea.hbm %s2490_s4, 2048 }
   0x5   :  { %p1959_p0 = scmp.ne.s32.totalorder %s2490_s4, %s1958_s11  ;;  %p1962_p1 = scmp.lt.u32.totalorder %s1958_s11, %s2490_s4 }
   0x7   :  { %p1964_p2 = pnand %p1962_p1, %p1959_p0 }
   0x9   :  { %1967 = shalt.err (!%p1964_p2)
}
   0xa   :  { %s1968_s16 = scalar_lea.vmem %s41_s28, 2048  ;;  %p1973_p4 = scmp.lt.s32.totalorder %s41_s28, %s41_s28 }
   0xb   :  { %p1969_p3 = scmp.ne.s32.totalorder %s41_s28, %s1968_s16  ;;  %p1974_p5 = scmp.lt.s32.totalorder %s1968_s16, %s1968_s16 }
   0xd   :  { %p1975_p6 = por %p1974_p5, %p1973_p4 }
   0xf   :  { %p1976_p7 = pnand %p1975_p6, %p1969_p3 }
  0x11   :  { %1979 = shalt.err (!%p1976_p7)
}
  0x12   :  { %s2054_s17 = smov 128   ;;  %s2055_s18 = smov 8  }
  0x13   :  { %46 = dma.hbm_to_vmem [thread:$0]  %s2490_s4, 2048, %s41_s28, [#allocation6], %s2054_s17, %s2054_s17, %s2055_s18  }
  0x14   :  { %s1980_s23 = scalar_lea.hbm %s2489_s3, 2048 }
  0x15   :  { %p1981_p8 = scmp.ne.s32.totalorder %s2489_s3, %s1980_s23  ;;  %p1984_p9 = scmp.lt.u32.totalorder %s1980_s23, %s2489_s3 }
  0x17   :  { %p1986_p10 = pnand %p1984_p9, %p1981_p8 }
  0x19   :  { %1989 = shalt.err (!%p1986_p10)
}
  0x1a   :  { %s1990_s29 = scalar_lea.vmem %s2106_s30, 2048  ;;  %p1995_p12 = scmp.lt.s32.totalorder %s2106_s30, %s2106_s30 }
  0x1b   :  { %p1991_p11 = scmp.ne.s32.totalorder %s2106_s30, %s1990_s29  ;;  %p1996_p13 = scmp.lt.s32.totalorder %s1990_s29, %s1990_s29 }
  0x1d   :  { %p1997_p0 = por %p1996_p13, %p1995_p12 }
  0x1f   :  { %p1998_p1 = pnand %p1997_p0, %p1991_p11 }
  0x21   :  { %2001 = shalt.err (!%p1998_p1)
}
  0x22   :  { %34 = dma.hbm_to_vmem [thread:$0]  %s2489_s3, 2048, %s2106_s30, [#allocation4], %s2054_s17, %s2054_s17, %s2055_s18  }
  0x23   :  { %s2056_s9 = smov [#allocation7]   ;;  %s2057_s11 = smov [#allocation8]  }
  0x24   :  { %s52_s10 = sshll.u32 %s2056_s9, 4  ;;  %s64_s12 = sshll.u32 %s2057_s11, 4  ;;  %s53_s10 = int_to_ptr.vmem [resolvable:$true] %s52_s10  ;;  %s2143_s12 = int_to_ptr.vmem [resolvable:$true] %s64_s12 }
  0x25   :  { %s2002_s15 = scalar_lea.hbm %s2491_s5, 2048 }
  0x26   :  { %p2003_p2 = scmp.ne.s32.totalorder %s2491_s5, %s2002_s15  ;;  %p2006_p3 = scmp.lt.u32.totalorder %s2002_s15, %s2491_s5 }
  0x28   :  { %p2008_p4 = pnand %p2006_p3, %p2003_p2 }
  0x2a   :  { %2011 = shalt.err (!%p2008_p4)
}
  0x2b   :  { %s2012_s3 = scalar_lea.vmem %s53_s10, 2048  ;;  %p2017_p6 = scmp.lt.s32.totalorder %s53_s10, %s53_s10 }
  0x2c   :  { %p2013_p5 = scmp.ne.s32.totalorder %s53_s10, %s2012_s3  ;;  %p2018_p7 = scmp.lt.s32.totalorder %s2012_s3, %s2012_s3 }
  0x2e   :  { %p2019_p8 = por %p2018_p7, %p2017_p6 }
  0x30   :  { %p2020_p9 = pnand %p2019_p8, %p2013_p5 }
  0x32   :  { %2023 = shalt.err (!%p2020_p9)
}
  0x33   :  { %58 = dma.hbm_to_vmem [thread:$0]  %s2491_s5, 2048, %s53_s10, [#allocation6], %s2054_s17, %s2054_s17, %s2055_s18  }
  0x34   :  { %s2024_s25 = scalar_lea.hbm %s2492_s6, 2048 }
  0x35   :  { %p2025_p10 = scmp.ne.s32.totalorder %s2492_s6, %s2024_s25  ;;  %p2028_p11 = scmp.lt.u32.totalorder %s2024_s25, %s2492_s6 }
  0x37   :  { %p2030_p12 = pnand %p2028_p11, %p2025_p10 }
  0x39   :  { %2033 = shalt.err (!%p2030_p12)
}
  0x3a   :  { %s2034_s28 = scalar_lea.vmem %s2143_s12, 2048  ;;  %p2039_p0 = scmp.lt.s32.totalorder %s2143_s12, %s2143_s12 }
  0x3b   :  { %p2035_p13 = scmp.ne.s32.totalorder %s2143_s12, %s2034_s28  ;;  %p2040_p1 = scmp.lt.s32.totalorder %s2034_s28, %s2034_s28 }
  0x3d   :  { %p2041_p2 = por %p2040_p1, %p2039_p0 }
  0x3f   :  { %p2042_p3 = pnand %p2041_p2, %p2035_p13 }
  0x41   :  { %2045 = shalt.err (!%p2042_p3)
}
  0x42   :  { %70 = dma.hbm_to_vmem [thread:$0]  %s2492_s6, 2048, %s2143_s12, [#allocation9], %s2054_s17, %s2054_s17, %s2055_s18  }
  0x43   :  { %2046 = dma.done.wait [#allocation4], 2048  }
  0x44   :  { %2047 = vsyncadd [#allocation4], 4294965248 }
  0x45   :  { %2048 = dma.done.wait [#allocation6], 4096  }
  0x46   :  { %2049 = vsyncadd [#allocation6], 4294963200 }
  0x47   :  { %2050 = dma.done.wait [#allocation9], 2048  }
  0x48   :  { %2051 = vsyncadd [#allocation9], 4294965248  ;;  %v2058_v0 = vmov 0.0|0.0   ;;  %vm2059_vm0 = vmmov 0   ;;  %v2060_v1 = vmov 0.0   ;;  %v101_v2 = vld [vmem:[#allocation5] sm:$0xff] }
  0x49   :  { %1761 = vmatprep.subr.bf16.mxu1 %v2058_v0  ;;  %1737 = vmatprep.subr.bf16.mxu0 %v2058_v0  ;;  %v102_v3 = vld [vmem:[#allocation5 + $0x8] sm:$0xff]  ;;  %v85_v4 = vld [vmem:[#allocation3] sm:$0xff]  ;;  %v103_v7 = vld [vmem:[#allocation5 + $0x10] sm:$0xff]  ;;  %vm451_vm1 = vcmask 1044480   ;;  %vm435_vm2 = vcmask 36864   ;;  %vm447_vm3 = vcmask 39936  }
  0x4a   :  { %1494 = vmatprep.mubr.msk.f32.mxu1 %vm2059_vm0, %v2060_v1  ;;  %1459 = vmatprep.mubr.msk.f32.mxu0 %vm2059_vm0, %v2060_v1  ;;  %v2186_v5 = vpack.c.bf16 %v102_v3, %v101_v2  ;;  %v86_v6 = vld [vmem:[#allocation3 + $0x8] sm:$0xff]  ;;  %v104_v8 = vld [vmem:[#allocation5 + $0x18] sm:$0xff]  ;;  %v87_v10 = vld [vmem:[#allocation3 + $0x10] sm:$0xff]  ;;  %vm634_vm4 = vcmask 1045504   ;;  %vm713_vm5 = vcmask 37888  }
  0x4b   :  { %v2188_v9 = vpack.c.bf16 %v86_v6, %v85_v4  ;;  %v88_v11 = vld [vmem:[#allocation3 + $0x18] sm:$0xff]  ;;  %v2191_v12 = vpack.c.bf16 %v104_v8, %v103_v7  ;;  %v105_v14 = vld [vmem:[#allocation5 + $0x20] sm:$0xff]  ;;  %v106_v15 = vld [vmem:[#allocation5 + $0x28] sm:$0xff] }
  0x4c   :  { %1763 = vmatpush3.bf16.msra.mxu1 %v2186_v5  ;;  %v2195_v13 = vpack.c.bf16 %v88_v11, %v87_v10  ;;  %v89_v16 = vld [vmem:[#allocation3 + $0x20] sm:$0xff]  ;;  %v90_v17 = vld [vmem:[#allocation3 + $0x28] sm:$0xff]  ;;  %v2199_v18 = vpack.c.bf16 %v106_v15, %v105_v14  ;;  %v107_v20 = vld [vmem:[#allocation5 + $0x30] sm:$0xff] }
  0x4d   :  { %1739 = vmatpush3.bf16.msra.mxu0 %v2188_v9  ;;  %1764 = vmatprep.subr.bf16.mxu1 %v2058_v0  ;;  %v2203_v19 = vpack.c.bf16 %v90_v17, %v89_v16  ;;  %v108_v21 = vld [vmem:[#allocation5 + $0x38] sm:$0xff]  ;;  %v91_v22 = vld [vmem:[#allocation3 + $0x30] sm:$0xff]  ;;  %v109_v26 = vld [vmem:[#allocation5 + $0x40] sm:$0xff] }
  0x4e   :  { %1740 = vmatprep.subr.bf16.mxu0 %v2058_v0  ;;  %v92_v23 = vld [vmem:[#allocation3 + $0x38] sm:$0xff]  ;;  %v2207_v24 = vpack.c.bf16 %v108_v21, %v107_v20  ;;  %v110_v27 = vld [vmem:[#allocation5 + $0x48] sm:$0xff]  ;;  %v93_v28 = vld [vmem:[#allocation3 + $0x40] sm:$0xff] }
  0x4f   :  { %v2211_v25 = vpack.c.bf16 %v92_v23, %v91_v22  ;;  %v94_v29 = vld [vmem:[#allocation3 + $0x48] sm:$0xff]  ;;  %v2215_v30 = vpack.c.bf16 %v110_v27, %v109_v26  ;;  %v111_v32 = vld [vmem:[#allocation5 + $0x50] sm:$0xff]  ;;  %v112_v33 = vld [vmem:[#allocation5 + $0x58] sm:$0xff] }
  0x50   :  { %1766 = vmatpush3.bf16.msra.mxu1 %v2191_v12  ;;  %v2219_v31 = vpack.c.bf16 %v94_v29, %v93_v28  ;;  %v95_v34 = vld [vmem:[#allocation3 + $0x50] sm:$0xff]  ;;  %v96_v35 = vld [vmem:[#allocation3 + $0x58] sm:$0xff]  ;;  %v2223_v36 = vpack.c.bf16 %v112_v33, %v111_v32  ;;  %v113_v38 = vld [vmem:[#allocation5 + $0x60] sm:$0xff] }
  0x51   :  { %1742 = vmatpush3.bf16.msra.mxu0 %v2195_v13  ;;  %1767 = vmatprep.subr.bf16.mxu1 %v2058_v0  ;;  %v2227_v37 = vpack.c.bf16 %v96_v35, %v95_v34  ;;  %v114_v39 = vld [vmem:[#allocation5 + $0x68] sm:$0xff]  ;;  %v97_v40 = vld [vmem:[#allocation3 + $0x60] sm:$0xff]  ;;  %v115_v44 = vld [vmem:[#allocation5 + $0x70] sm:$0xff] }
  0x52   :  { %1743 = vmatprep.subr.bf16.mxu0 %v2058_v0  ;;  %v98_v41 = vld [vmem:[#allocation3 + $0x68] sm:$0xff]  ;;  %v2231_v42 = vpack.c.bf16 %v114_v39, %v113_v38  ;;  %v116_v45 = vld [vmem:[#allocation5 + $0x78] sm:$0xff]  ;;  %v99_v46 = vld [vmem:[#allocation3 + $0x70] sm:$0xff] }
  0x53   :  { %v2235_v43 = vpack.c.bf16 %v98_v41, %v97_v40  ;;  %v100_v47 = vld [vmem:[#allocation3 + $0x78] sm:$0xff]  ;;  %v2239_v48 = vpack.c.bf16 %v116_v45, %v115_v44  ;;  %v117_v50 = vld [vmem:[#allocation7] sm:$0xff]  ;;  %v118_v51 = vld [vmem:[#allocation7 + $0x8] sm:$0xff] }
  0x54   :  { %1769 = vmatpush3.bf16.msra.mxu1 %v2199_v18  ;;  %v2243_v49 = vpack.c.bf16 %v100_v47, %v99_v46  ;;  %v2250_v52 = vld [vmem:[%s2487_s1] sm:$0x1f]  ;;  %v2253_v53 = vpack.c.bf16 %v118_v51, %v117_v50  ;;  %v119_v54 = vld [vmem:[#allocation7 + $0x10] sm:$0xff]  ;;  %v120_v55 = vld [vmem:[#allocation7 + $0x18] sm:$0xff] }
  0x55   :  { %1745 = vmatpush3.bf16.msra.mxu0 %v2203_v19  ;;  %1770 = vmatprep.subr.bf16.mxu1 %v2058_v0  ;;  %v2262_v56 = vpack.c.bf16 %v120_v55, %v119_v54  ;;  %v121_v57 = vld [vmem:[#allocation7 + $0x20] sm:$0xff]  ;;  %v122_v58 = vld [vmem:[#allocation7 + $0x28] sm:$0xff]  ;;  %v123_v60 = vld [vmem:[#allocation7 + $0x30] sm:$0xff] }
  0x56   :  { %1746 = vmatprep.subr.bf16.mxu0 %v2058_v0  ;;  %v2268_v59 = vpack.c.bf16 %v122_v58, %v121_v57  ;;  %v124_v61 = vld [vmem:[#allocation7 + $0x38] sm:$0xff]  ;;  %v125_v63 = vld [vmem:[#allocation7 + $0x40] sm:$0xff]  ;;  %v126_v2 = vld [vmem:[#allocation7 + $0x48] sm:$0xff] }
  0x57   :  { %v2272_v62 = vpack.c.bf16 %v124_v61, %v123_v60  ;;  %v2276_v3 = vpack.c.bf16 %v126_v2, %v125_v63  ;;  %v127_v4 = vld [vmem:[#allocation7 + $0x50] sm:$0xff]  ;;  %v128_v6 = vld [vmem:[#allocation7 + $0x58] sm:$0xff]  ;;  %v129_v8 = vld [vmem:[#allocation7 + $0x60] sm:$0xff] }
  0x58   :  { %1772 = vmatpush3.bf16.msra.mxu1 %v2207_v24  ;;  %v2280_v7 = vpack.c.bf16 %v128_v6, %v127_v4  ;;  %v130_v10 = vld [vmem:[#allocation7 + $0x68] sm:$0xff]  ;;  %v131_v14 = vld [vmem:[#allocation7 + $0x70] sm:$0xff]  ;;  %v132_v15 = vld [vmem:[#allocation7 + $0x78] sm:$0xff] }
  0x59   :  { %1748 = vmatpush3.bf16.msra.mxu0 %v2211_v25  ;;  %1773 = vmatprep.subr.bf16.mxu1 %v2058_v0  ;;  %v2284_v11 = vpack.c.bf16 %v130_v10, %v129_v8  ;;  %v2288_v16 = vpack.c.bf16 %v132_v15, %v131_v14  ;;  %v133_v41 = vld [vmem:[#allocation8] sm:$0xff]  ;;  %v134_v44 = vld [vmem:[#allocation8 + $0x8] sm:$0xff]  ;;  %v135_v50 = vld [vmem:[#allocation8 + $0x10] sm:$0xff] }
  0x5a   :  { %1749 = vmatprep.subr.bf16.mxu0 %v2058_v0  ;;  %v2303_v46 = vpack.c.bf16 %v134_v44, %v133_v41  ;;  %v136_v51 = vld [vmem:[#allocation8 + $0x18] sm:$0xff]  ;;  %v137_v55 = vld [vmem:[#allocation8 + $0x20] sm:$0xff]  ;;  %v138_v57 = vld [vmem:[#allocation8 + $0x28] sm:$0xff] }
  0x5b   :  { %v2307_v54 = vpack.c.bf16 %v136_v51, %v135_v50  ;;  %v2313_v58 = vpack.c.bf16 %v138_v57, %v137_v55  ;;  %v139_v60 = vld [vmem:[#allocation8 + $0x30] sm:$0xff]  ;;  %v140_v61 = vld [vmem:[#allocation8 + $0x38] sm:$0xff]  ;;  %v141_v2 = vld [vmem:[#allocation8 + $0x40] sm:$0xff] }
  0x5c   :  { %1775 = vmatpush3.bf16.msra.mxu1 %v2215_v30  ;;  %v2317_v63 = vpack.c.bf16 %v140_v61, %v139_v60  ;;  %v142_v4 = vld [vmem:[#allocation8 + $0x48] sm:$0xff]  ;;  %v143_v8 = vld [vmem:[#allocation8 + $0x50] sm:$0xff]  ;;  %v144_v10 = vld [vmem:[#allocation8 + $0x58] sm:$0xff] }
  0x5d   :  { %1751 = vmatpush3.bf16.msra.mxu0 %v2219_v31  ;;  %1776 = vmatprep.subr.bf16.mxu1 %v2058_v0  ;;  %v2321_v6 = vpack.c.bf16 %v142_v4, %v141_v2  ;;  %v2325_v14 = vpack.c.bf16 %v144_v10, %v143_v8  ;;  %v145_v15 = vld [vmem:[#allocation8 + $0x60] sm:$0xff]  ;;  %v2385_v61 = vld [vmem:[%s2487_s1 + $0x8] sm:$0x1f] }
  0x5e   :  { %1752 = vmatprep.subr.bf16.mxu0 %v2058_v0  ;;  %v2377_v50 = vld [vmem:[%s2493_s7 + $0x2] ss:$0 sm:$0xff] }
  0x60   :  { %1778 = vmatpush3.bf16.msra.mxu1 %v2223_v36 }
  0x61   :  { %1754 = vmatpush3.bf16.msra.mxu0 %v2227_v37  ;;  %1779 = vmatprep.subr.bf16.mxu1 %v2058_v0 }
  0x62   :  { %1755 = vmatprep.subr.bf16.mxu0 %v2058_v0 }
  0x64   :  { %1781 = vmatpush3.bf16.msra.mxu1 %v2231_v42 }
  0x65   :  { %1757 = vmatpush3.bf16.msra.mxu0 %v2235_v43  ;;  %1782 = vmatprep.subr.bf16.mxu1 %v2058_v0 }
  0x66   :  { %1758 = vmatprep.subr.bf16.mxu0 %v2058_v0 }
  0x68   :  { %1784 = vmatpush3.bf16.msra.mxu1 %v2239_v48 }
  0x69   :  { %1760 = vmatpush3.bf16.msra.mxu0 %v2243_v49  ;;  %1537 = vmatprep.subr.mxu1 %v2060_v1 }
  0x6a   :  { %1785 = vmatprep.subr.bf16.mxu0 %v2058_v0 }
  0x6b   :  { %1495 = vmatmul.mubr.f32.vlgmr.msra.gmra.mrb[0].mxu1 %v2250_v52 }
  0x6c   :  { %1460 = vmatmul.mubr.f32.vlgmr.msra.gmra.mrb[0].mxu0 %v2250_v52  ;;  %1539 = vmatprep.mubr.msk.f32.mxu1 %vm2059_vm0, %v2060_v1 }
  0x6d   :  { %1787 = vmatpush3.bf16.msra.mxu0 %v2253_v53  ;;  %1529 = vmatprep.mubr.msk.f32.mxu0 %vm2059_vm0, %v2060_v1 }
  0x6e   :  { %1788 = vmatprep.subr.bf16.mxu0 %v2058_v0 }
  0x71   :  { %1790 = vmatpush3.bf16.msra.mxu0 %v2262_v56 }
  0x72   :  { %1791 = vmatprep.subr.bf16.mxu0 %v2058_v0 }
  0x75   :  { %1793 = vmatpush3.bf16.msra.mxu0 %v2268_v59 }
  0x76   :  { %1794 = vmatprep.subr.bf16.mxu0 %v2058_v0 }
  0x79   :  { %1796 = vmatpush3.bf16.msra.mxu0 %v2272_v62 }
  0x7a   :  { %1797 = vmatprep.subr.bf16.mxu0 %v2058_v0 }
  0x7d   :  { %1799 = vmatpush3.bf16.msra.mxu0 %v2276_v3 }
  0x7e   :  { %1800 = vmatprep.subr.bf16.mxu0 %v2058_v0 }
  0x81   :  { %1802 = vmatpush3.bf16.msra.mxu0 %v2280_v7 }
  0x82   :  { %1803 = vmatprep.subr.bf16.mxu0 %v2058_v0 }
  0x85   :  { %1805 = vmatpush3.bf16.msra.mxu0 %v2284_v11 }
  0x86   :  { %1806 = vmatprep.subr.bf16.mxu0 %v2058_v0 }
  0x89   :  { %1808 = vmatpush3.bf16.msra.mxu0 %v2288_v16 }
  0x8a   :  { %1532 = vmatprep.subr.mxu0 %v2060_v1 }
  0x8c   :  { %1530 = vmatmul.mubr.f32.vlgmr.msra.gmra.mrb[2].mxu0 %v2250_v52 }
  0x8d   :  { %1534 = vmatprep.mubr.msk.f32.mxu0 %vm2059_vm0, %v2060_v1 }
 0x13e   :  { %v290_v17 = vpop.f32.mrb[0].mxu1 }
 0x13f   :  { %v1496_v20 = vpop.f32.mrb[1].mxu1  ;;  %1533 = vmatpush3.xpose.msra.mxu0 %v290_v17  ;;  %v220_v21 = vpop.f32.mrb[0].mxu0  ;;  %v146_v17 = vld [vmem:[#allocation8 + $0x68] sm:$0xff] }
 0x140   :  { %v1461_v22 = vpop.f32.mrb[1].mxu0  ;;  %1577 = vmatprep.subr.mxu0 %v2060_v1  ;;  %v2329_v20 = vpack.c.bf16 %v146_v17, %v145_v15 }
 0x141   :  { %v148_v22 = vld [vmem:[#allocation8 + $0x78] sm:$0xff] }
 0x142   :  { %1535 = vmatmul.mubr.f32.vlgmr.msra.gmra.mrb[4].mxu0 %v220_v21  ;;  %v147_v21 = vld [vmem:[#allocation8 + $0x70] sm:$0xff] }
 0x143   :  { %1579 = vmatprep.mubr.msk.f32.mxu0 %vm2059_vm0, %v2060_v1 }
 0x15f   :  { %v360_v23 = vpop.f32.mrb[2].mxu0 }
 0x160   :  { %v1531_v26 = vpop.f32.mrb[3].mxu0  ;;  %1538 = vmatpush3.msk.msra.mxu1 %vm451_vm1, %v360_v23  ;;  %v2333_v23 = vpack.c.bf16 %v148_v22, %v147_v21 }
 0x161   :  { %1809 = vmatprep.subr.bf16.mxu1 %v2058_v0 }
 0x215   :  { %v430_v27 = vpop.f32.mrb[4].mxu0 }
 0x216   :  { %v434_v28 = vmul.f32 0.125, %v430_v27  ;;  %v1536_v29 = vpop.f32.mrb[5].mxu0 }
 0x218   :  { %v436_v32 = vsel %vm435_vm2, %v434_v28, -inf }
 0x219   :  { %437 = vmax.xlane.f32.xlu0 %v436_v32 }
 0x2a6   :  { %v438_v33 = vpop.xlane.xlu0 %437 }
 0x2a7   :  { %v439_v34 = vsub.f32 %v434_v28, %v438_v33 }
 0x2a9   :  { %v440_v35 = vmul.f32 1.442695, %v439_v34 }
 0x2ab   :  { %1938 = vpow2.f32 %v440_v35 }
 0x2b5   :  { %v1939_v38 = vpop.eup %1938 }
 0x2b6   :  { %v442_v39 = vsel %vm435_vm2, %v1939_v38, 0.0 }
 0x2b7   :  { %443 = vadd.xlane.f32.xlu0 %v442_v39 }
 0x344   :  { %v444_v40 = vpop.xlane.xlu0 %443 }
 0x345   :  { %1940 = vrcp.f32 %v444_v40 }
 0x34f   :  { %v1941_v45 = vpop.eup %1940 }
 0x350   :  { %v446_v47 = vmul.f32 %v1941_v45, %v1939_v38  ;;  %v2372_v45 = vld [vmem:[%s2493_s7 + $0x1] ss:$0 sm:$0xff] }
 0x352   :  { %1540 = vmatmul.mubr.msk.f32.vlgmr.msra.gmra.mrb[2].mxu1 %vm447_vm3, %v446_v47 }
 0x353   :  { %1811 = vmatpush3.bf16.msra.mxu1 %v2303_v46  ;;  %1574 = vmatprep.mubr.msk.f32.mxu1 %vm2059_vm0, %v2060_v1 }
 0x354   :  { %1812 = vmatprep.subr.bf16.mxu1 %v2058_v0 }
 0x357   :  { %1814 = vmatpush3.bf16.msra.mxu1 %v2307_v54 }
 0x358   :  { %1815 = vmatprep.subr.bf16.mxu1 %v2058_v0 }
 0x35b   :  { %1817 = vmatpush3.bf16.msra.mxu1 %v2313_v58 }
 0x35c   :  { %1818 = vmatprep.subr.bf16.mxu1 %v2058_v0 }
 0x35f   :  { %1820 = vmatpush3.bf16.msra.mxu1 %v2317_v63 }
 0x360   :  { %1821 = vmatprep.subr.bf16.mxu1 %v2058_v0 }
 0x363   :  { %1823 = vmatpush3.bf16.msra.mxu1 %v2321_v6 }
 0x364   :  { %1824 = vmatprep.subr.bf16.mxu1 %v2058_v0 }
 0x367   :  { %1826 = vmatpush3.bf16.msra.mxu1 %v2325_v14 }
 0x368   :  { %1827 = vmatprep.subr.bf16.mxu1 %v2058_v0 }
 0x36b   :  { %1829 = vmatpush3.bf16.msra.mxu1 %v2329_v20 }
 0x36c   :  { %1830 = vmatprep.subr.bf16.mxu1 %v2058_v0 }
 0x36f   :  { %1832 = vmatpush3.bf16.msra.mxu1 %v2333_v23 }
 0x370   :  { %1857 = vmatprep.subr.bf16.mxu1 %v2058_v0 }
 0x425   :  { %v521_v26 = vpop.f32.mrb[2].mxu1 }
 0x426   :  { %v1541_v27 = vpop.f32.mrb[3].mxu1  ;;  %1575 = vmatmul.mubr.f32.vlgmr.msra.gmra.mrb[4].mxu1 %v521_v26 }
 0x427   :  { %1859 = vmatpush3.bf16.msra.mxu1 %v2186_v5  ;;  %1649 = vmatprep.mubr.msk.f32.mxu1 %vm2059_vm0, %v2060_v1  ;;  %v2359_v5 = vld [vmem:[%s2493_s7] ss:$0 sm:$0xff] }
 0x428   :  { %1860 = vmatprep.subr.bf16.mxu1 %v2058_v0 }
 0x42b   :  { %1862 = vmatpush3.bf16.msra.mxu1 %v2191_v12 }
 0x42c   :  { %1863 = vmatprep.subr.bf16.mxu1 %v2058_v0 }
 0x42f   :  { %1865 = vmatpush3.bf16.msra.mxu1 %v2199_v18 }
 0x430   :  { %1866 = vmatprep.subr.bf16.mxu1 %v2058_v0 }
 0x433   :  { %1868 = vmatpush3.bf16.msra.mxu1 %v2207_v24 }
 0x434   :  { %1869 = vmatprep.subr.bf16.mxu1 %v2058_v0 }
 0x437   :  { %1871 = vmatpush3.bf16.msra.mxu1 %v2215_v30 }
 0x438   :  { %1872 = vmatprep.subr.bf16.mxu1 %v2058_v0 }
 0x43b   :  { %1874 = vmatpush3.bf16.msra.mxu1 %v2223_v36 }
 0x43c   :  { %1875 = vmatprep.subr.bf16.mxu1 %v2058_v0 }
 0x43f   :  { %1877 = vmatpush3.bf16.msra.mxu1 %v2231_v42 }
 0x440   :  { %1878 = vmatprep.subr.bf16.mxu1 %v2058_v0 }
 0x443   :  { %1880 = vmatpush3.bf16.msra.mxu1 %v2239_v48  ;;  %v625_v48 = vld [vmem:[%s2488_s2] sm:$0x3f] }
 0x444   :  { %1687 = vmatprep.subr.mxu1 %v2060_v1  ;;  %v633_v29 = vmul.f32 %v625_v48, %v625_v48 }
 0x446   :  { %v635_v32 = vsel %vm634_vm4, %v633_v29, 0.0  ;;  %1650 = vmatmul.mubr.f32.vlgmr.msra.gmra.mrb[6].mxu1 %v2385_v61 }
 0x447   :  { %1689 = vmatprep.mubr.msk.f32.mxu1 %vm2059_vm0, %v2060_v1 }
 0x4f9   :  { %v595_v12 = vpop.f32.mrb[4].mxu1 }
 0x4fa   :  { %v596_v18 = vadd.f32 %v2359_v5, %v595_v12  ;;  %v1576_v24 = vpop.f32.mrb[5].mxu1 }
 0x4fc   :  { %v599_v30 = vadd.f32 %v596_v18, %v2250_v52 }
 0x4fe   :  { %v600_v36 = vsel %vm451_vm1, %v599_v30, 0.0  ;;  %v604_v42 = vmul.f32 %v599_v30, %v599_v30 }
 0x4ff   :  { %601 = vadd.xlane.f32.xlu1 %v600_v36 }
 0x500   :  { %v605_v28 = vsel %vm451_vm1, %v604_v42, 0.0 }
 0x503   :  { %606 = vadd.xlane.f32.xlu1 %v605_v28 }
 0x507   :  { %636 = vadd.xlane.f32.xlu1 %v635_v32 }
 0x58c   :  { %v602_v33 = vpop.xlane.xlu1 %601 }
 0x58d   :  { %v603_v34 = vmul.f32 0.015625, %v602_v33 }
 0x58f   :  { %v609_v52 = vmul.f32 %v603_v34, %v603_v34  ;;  %v611_v41 = vsub.f32 %v599_v30, %v603_v34 }
 0x590   :  { %v607_v35 = vpop.xlane.xlu1 %606 }
 0x591   :  { %v608_v38 = vmul.f32 0.015625, %v607_v35 }
 0x593   :  { %v610_v39 = vsub.f32 %v608_v38, %v609_v52 }
 0x594   :  { %v637_v2 = vpop.xlane.xlu1 %636 }
 0x595   :  { %v612_v40 = vadd.f32 1e-05, %v610_v39  ;;  %v638_v4 = vmax.f32 %v637_v2, 1e-24 }
 0x597   :  { %1942 = vrsqrt.f32 %v612_v40 }
 0x598   :  { %1944 = vrsqrt.f32 %v638_v4 }
 0x5a1   :  { %v1943_v44 = vpop.eup %1942 }
 0x5a2   :  { %v614_v47 = vmul.f32 %v1943_v44, %v611_v41  ;;  %v1945_v15 = vpop.eup %1944 }
 0x5a3   :  { %v640_v22 = vmul.f32 %v1945_v15, %v625_v48 }
 0x5a4   :  { %v619_v51 = vmul.f32 %v2372_v45, %v614_v47 }
 0x5a6   :  { %v624_v55 = vadd.f32 %v2377_v50, %v619_v51 }
 0x5a8   :  { %v626_v57 = vmul.f32 %v624_v55, %v624_v55 }
 0x5aa   :  { %v627_v60 = vsel %vm451_vm1, %v626_v57, 0.0 }
 0x5ab   :  { %628 = vadd.xlane.f32.xlu0 %v627_v60 }
 0x638   :  { %v629_v8 = vpop.xlane.xlu0 %628 }
 0x639   :  { %v630_v10 = vmax.f32 %v629_v8, 1e-24 }
 0x63b   :  { %1946 = vrsqrt.f32 %v630_v10 }
 0x645   :  { %v1947_v17 = vpop.eup %1946 }
 0x646   :  { %v632_v21 = vmul.f32 %v1947_v17, %v624_v55 }
 0x648   :  { %1578 = vmatpush3.xpose.msra.mxu0 %v632_v21 }
 0x649   :  { %1833 = vmatprep.subr.bf16.mxu0 %v2058_v0 }
 0x64b   :  { %1580 = vmatmul.mubr.f32.vlgmr.msra.gmra.mrb[6].mxu0 %v640_v22 }
 0x64c   :  { %1835 = vmatpush3.bf16.msra.mxu0 %v2188_v9  ;;  %1614 = vmatprep.mubr.msk.f32.mxu0 %vm2059_vm0, %v2060_v1  ;;  %v853_v9 = vpop.f32.mrb[6].mxu1 }
 0x64d   :  { %1836 = vmatprep.subr.bf16.mxu0 %v2058_v0  ;;  %1688 = vmatpush3.xpose.msra.mxu1 %v853_v9 }
 0x64e   :  { %1692 = vmatprep.subr.mxu1 %v2060_v1 }
 0x650   :  { %1838 = vmatpush3.bf16.msra.mxu0 %v2195_v13  ;;  %v1651_v13 = vpop.f32.mrb[7].mxu1 }
 0x651   :  { %1839 = vmatprep.subr.bf16.mxu0 %v2058_v0 }
 0x654   :  { %1841 = vmatpush3.bf16.msra.mxu0 %v2203_v19  ;;  %v711_v19 = vstv %s2486_s0 }
 0x655   :  { %1842 = vmatprep.subr.bf16.mxu0 %v2058_v0 }
 0x658   :  { %1844 = vmatpush3.bf16.msra.mxu0 %v2211_v25 }
 0x659   :  { %1845 = vmatprep.subr.bf16.mxu0 %v2058_v0 }
 0x65c   :  { %1847 = vmatpush3.bf16.msra.mxu0 %v2219_v31 }
 0x65d   :  { %1848 = vmatprep.subr.bf16.mxu0 %v2058_v0 }
 0x660   :  { %1850 = vmatpush3.bf16.msra.mxu0 %v2227_v37 }
 0x661   :  { %1851 = vmatprep.subr.bf16.mxu0 %v2058_v0 }
 0x664   :  { %1853 = vmatpush3.bf16.msra.mxu0 %v2235_v43 }
 0x665   :  { %1854 = vmatprep.subr.bf16.mxu0 %v2058_v0 }
 0x668   :  { %1856 = vmatpush3.bf16.msra.mxu0 %v2243_v49 }
 0x669   :  { %1881 = vmatprep.subr.bf16.mxu0 %v2058_v0 }
 0x66b   :  { %1615 = vmatmul.mubr.f32.vlgmr.msra.gmra.mrb[8].mxu0 %v2385_v61 }
 0x66c   :  { %1883 = vmatpush3.bf16.msra.mxu0 %v2253_v53  ;;  %1684 = vmatprep.mubr.msk.f32.mxu0 %vm2059_vm0, %v2060_v1 }
 0x66d   :  { %1884 = vmatprep.subr.bf16.mxu0 %v2058_v0 }
 0x670   :  { %1886 = vmatpush3.bf16.msra.mxu0 %v2262_v56 }
 0x671   :  { %1887 = vmatprep.subr.bf16.mxu0 %v2058_v0 }
 0x674   :  { %1889 = vmatpush3.bf16.msra.mxu0 %v2268_v59 }
 0x675   :  { %1890 = vmatprep.subr.bf16.mxu0 %v2058_v0 }
 0x678   :  { %1892 = vmatpush3.bf16.msra.mxu0 %v2272_v62 }
 0x679   :  { %1893 = vmatprep.subr.bf16.mxu0 %v2058_v0 }
 0x67c   :  { %1895 = vmatpush3.bf16.msra.mxu0 %v2276_v3 }
 0x67d   :  { %1896 = vmatprep.subr.bf16.mxu0 %v2058_v0 }
 0x680   :  { %1898 = vmatpush3.bf16.msra.mxu0 %v2280_v7 }
 0x681   :  { %1899 = vmatprep.subr.bf16.mxu0 %v2058_v0 }
 0x684   :  { %1901 = vmatpush3.bf16.msra.mxu0 %v2284_v11 }
 0x685   :  { %1902 = vmatprep.subr.bf16.mxu0 %v2058_v0 }
 0x688   :  { %1904 = vmatpush3.bf16.msra.mxu0 %v2288_v16 }
 0x689   :  { %1732 = vmatprep.subr.mxu0 %v2060_v1 }
 0x68b   :  { %1685 = vmatmul.mubr.f32.vlgmr.msra.gmra.mrb[10].mxu0 %v2385_v61 }
 0x68c   :  { %1734 = vmatprep.mubr.msk.f32.mxu0 %vm2059_vm0, %v2060_v1 }
 0x71e   :  { %v707_v25 = vpop.f32.mrb[6].mxu0 }
 0x71f   :  { %v712_v31 = vmul.f32 %v711_v19, %v707_v25  ;;  %v1581_v37 = vpop.f32.mrb[7].mxu0 }
 0x721   :  { %714 = vst.msk [vmem:[%s2494_s8] sm:$0x3f] %vm713_vm5, %v712_v31 }
 0x73e   :  { %v783_v43 = vpop.f32.mrb[8].mxu0 }
 0x73f   :  { %v1616_v49 = vpop.f32.mrb[9].mxu0  ;;  %1690 = vmatmul.mubr.f32.vlgmr.msra.gmra.mrb[8].mxu1 %v783_v43 }
 0x740   :  { %1694 = vmatprep.mubr.msk.f32.mxu1 %vm2059_vm0, %v2060_v1 }
 0x75e   :  { %v923_v27 = vpop.f32.mrb[10].mxu0 }
 0x75f   :  { %v1686_v12 = vpop.f32.mrb[11].mxu0  ;;  %1693 = vmatpush3.msk.msra.mxu1 %vm451_vm1, %v923_v27 }
 0x760   :  { %1905 = vmatprep.subr.bf16.mxu1 %v2058_v0 }
 0x812   :  { %v993_v53 = vpop.f32.mrb[8].mxu1 }
 0x813   :  { %v997_v56 = vmul.f32 0.125, %v993_v53  ;;  %v1691_v59 = vpop.f32.mrb[9].mxu1 }
 0x815   :  { %v998_v62 = vsel %vm435_vm2, %v997_v56, -inf }
 0x816   :  { %999 = vmax.xlane.f32.xlu0 %v998_v62 }
 0x8a3   :  { %v1000_v3 = vpop.xlane.xlu0 %999 }
 0x8a4   :  { %v1001_v7 = vsub.f32 %v997_v56, %v1000_v3 }
 0x8a6   :  { %v1002_v11 = vmul.f32 1.442695, %v1001_v7 }
 0x8a8   :  { %1948 = vpow2.f32 %v1002_v11 }
 0x8b2   :  { %v1949_v16 = vpop.eup %1948 }
 0x8b3   :  { %v1004_v26 = vsel %vm435_vm2, %v1949_v16, 0.0 }
 0x8b4   :  { %1005 = vadd.xlane.f32.xlu1 %v1004_v26 }
 0x941   :  { %v1006_v18 = vpop.xlane.xlu1 %1005 }
 0x942   :  { %1950 = vrcp.f32 %v1006_v18 }
 0x94c   :  { %v1951_v24 = vpop.eup %1950 }
 0x94d   :  { %v1008_v30 = vmul.f32 %v1951_v24, %v1949_v16 }
 0x94f   :  { %1695 = vmatmul.mubr.msk.f32.vlgmr.msra.gmra.mrb[10].mxu1 %vm447_vm3, %v1008_v30 }
 0x950   :  { %1907 = vmatpush3.bf16.msra.mxu1 %v2303_v46  ;;  %1729 = vmatprep.mubr.msk.f32.mxu1 %vm2059_vm0, %v2060_v1 }
 0x951   :  { %1908 = vmatprep.subr.bf16.mxu1 %v2058_v0 }
 0x954   :  { %1910 = vmatpush3.bf16.msra.mxu1 %v2307_v54 }
 0x955   :  { %1911 = vmatprep.subr.bf16.mxu1 %v2058_v0 }
 0x958   :  { %1913 = vmatpush3.bf16.msra.mxu1 %v2313_v58 }
 0x959   :  { %1914 = vmatprep.subr.bf16.mxu1 %v2058_v0 }
 0x95c   :  { %1916 = vmatpush3.bf16.msra.mxu1 %v2317_v63 }
 0x95d   :  { %1917 = vmatprep.subr.bf16.mxu1 %v2058_v0 }
 0x960   :  { %1919 = vmatpush3.bf16.msra.mxu1 %v2321_v6 }
 0x961   :  { %1920 = vmatprep.subr.bf16.mxu1 %v2058_v0 }
 0x964   :  { %1922 = vmatpush3.bf16.msra.mxu1 %v2325_v14 }
 0x965   :  { %1923 = vmatprep.subr.bf16.mxu1 %v2058_v0 }
 0x968   :  { %1925 = vmatpush3.bf16.msra.mxu1 %v2329_v20 }
 0x969   :  { %1926 = vmatprep.subr.bf16.mxu1 %v2058_v0  ;;  %v1277_v0 = vld [vmem:[%s2488_s2 + $0x8] sm:$0x3f] }
 0x96a   :  { %v1182_v20 = vmul.f32 %v1277_v0, %v1277_v0 }
 0x96c   :  { %1928 = vmatpush3.bf16.msra.mxu1 %v2333_v23  ;;  %v1183_v23 = vsel %vm634_vm4, %v1182_v20, 0.0 }
 0xa22   :  { %v1081_v1 = vpop.f32.mrb[10].mxu1 }
 0xa23   :  { %v1696_v46 = vpop.f32.mrb[11].mxu1  ;;  %1730 = vmatmul.mubr.f32.vlgmr.msra.gmra.mrb[12].mxu1 %v1081_v1 }
 0xaf6   :  { %v1151_v54 = vpop.f32.mrb[12].mxu1 }
 0xaf7   :  { %v1152_v58 = vadd.f32 %v2359_v5, %v1151_v54  ;;  %v1731_v63 = vpop.f32.mrb[13].mxu1 }
 0xaf9   :  { %v1155_v6 = vadd.f32 %v2385_v61, %v1152_v58 }
 0xafb   :  { %v1156_v36 = vsel %vm451_vm1, %v1155_v6, 0.0  ;;  %v1160_v14 = vmul.f32 %v1155_v6, %v1155_v6 }
 0xafc   :  { %1157 = vadd.xlane.f32.xlu0 %v1156_v36 }
 0xafd   :  { %v1161_v42 = vsel %vm451_vm1, %v1160_v14, 0.0 }
 0xafe   :  { %1162 = vadd.xlane.f32.xlu1 %v1161_v42 }
 0xb02   :  { %1184 = vadd.xlane.f32.xlu1 %v1183_v23 }
 0xb89   :  { %v1158_v28 = vpop.xlane.xlu0 %1157 }
 0xb8a   :  { %v1159_v5 = vmul.f32 0.015625, %v1158_v28 }
 0xb8b   :  { %v1163_v48 = vpop.xlane.xlu1 %1162 }
 0xb8c   :  { %v1165_v29 = vmul.f32 %v1159_v5, %v1159_v5  ;;  %v1164_v32 = vmul.f32 0.015625, %v1163_v48  ;;  %v1167_v35 = vsub.f32 %v1155_v6, %v1159_v5 }
 0xb8e   :  { %v1166_v33 = vsub.f32 %v1164_v32, %v1165_v29 }
 0xb8f   :  { %v1185_v47 = vpop.xlane.xlu1 %1184 }
 0xb90   :  { %v1168_v34 = vadd.f32 1e-05, %v1166_v33  ;;  %v1186_v51 = vmax.f32 %v1185_v47, 1e-24 }
 0xb92   :  { %1952 = vrsqrt.f32 %v1168_v34 }
 0xb93   :  { %1954 = vrsqrt.f32 %v1186_v51 }
 0xb9c   :  { %v1953_v52 = vpop.eup %1952 }
 0xb9d   :  { %v1170_v38 = vmul.f32 %v1953_v52, %v1167_v35  ;;  %v1955_v60 = vpop.eup %1954 }
 0xb9e   :  { %v1188_v4 = vmul.f32 %v1955_v60, %v1277_v0 }
 0xb9f   :  { %v1171_v39 = vmul.f32 %v2372_v45, %v1170_v38 }
 0xba1   :  { %v1172_v40 = vadd.f32 %v2377_v50, %v1171_v39 }
 0xba3   :  { %v1175_v41 = vmul.f32 %v1172_v40, %v1172_v40 }
 0xba5   :  { %v1176_v44 = vsel %vm451_vm1, %v1175_v41, 0.0 }
 0xba6   :  { %1177 = vadd.xlane.f32.xlu0 %v1176_v44 }
 0xc33   :  { %v1178_v55 = vpop.xlane.xlu0 %1177 }
 0xc34   :  { %v1179_v57 = vmax.f32 %v1178_v55, 1e-24 }
 0xc36   :  { %1956 = vrsqrt.f32 %v1179_v57 }
 0xc40   :  { %v1957_v61 = vpop.eup %1956 }
 0xc41   :  { %v1181_v2 = vmul.f32 %v1957_v61, %v1172_v40 }
 0xc43   :  { %1733 = vmatpush3.xpose.msra.mxu0 %v1181_v2 }
 0xc46   :  { %1735 = vmatmul.mubr.f32.vlgmr.msra.gmra.mrb[12].mxu0 %v1188_v4 }
 0xd19   :  { %v1255_v8 = vpop.f32.mrb[12].mxu0 }
 0xd1a   :  { %v1259_v45 = vmul.f32 %v1255_v8, %v711_v19  ;;  %v1736_v50 = vpop.f32.mrb[13].mxu0 }
 0xd1c   :  { %1278 = vst.msk [vmem:[%s2494_s8 + $0x8] sm:$0x3f] %vm713_vm5, %v1259_v45 }
 0xd1d   :  { %1266 = vsyncpa [#allocation4], 1 }
 0xd1e   :  { %1267 = vsyncpa [#allocation6], 1 }
 0xd1f   :  { %1268 = vsyncpa [#allocation9], 1 }

</bundles_post_ra>
